<compile_context>
chip_gen: v5e
topology: v5e:2x2
jax: 0.10.0
libtpu: 0.0.40
codegen_flags: <defaults>
</compile_context>

<pallas_src>
import numpy as np
import jax
import jax.numpy as jnp
from jax.experimental import pallas as pl
from jax.experimental.pallas import tpu as pltpu


def _assigner_kernel(centers_ref, thresh_ref, regconst_ref, kp_ref, neg_ref,
                     cls_ref, reg_ref):
    """One grid step = (one batch row, one keypoint tile).

    centers_ref : SMEM (K, 3)      f32   box centers
    thresh_ref  : SMEM (B, C*K)    f32   r^2 if box k is class c and in batch b else -1
    regconst_ref: SMEM (C, 7)      f32   per-class regression constants
    kp_ref      : VMEM (1, 3, tn)  f32   keypoints, lanes = keypoints
    neg_ref     : VMEM (1, tn)     f32   0/1 negative mask (shared over batch)
    cls_ref     : VMEM (1, C+2, tn) int32
    reg_ref     : VMEM (1, C*7, tn) f32
    """
    b = pl.program_id(0)
    K = centers_ref.shape[0]
    C = regconst_ref.shape[0]

    kp = kp_ref[...]                                   # (1, 3, tn)
    x = kp[:, 0, :]                                    # (1, tn)
    y = kp[:, 1, :]
    z = kp[:, 2, :]

    # --- squared distance to every box center (no sqrt) ---
    d2 = []
    for k in range(K):
        dx = x - centers_ref[k, 0]
        dy = y - centers_ref[k, 1]
        dz = z - centers_ref[k, 2]
        d2.append(dx * dx + dy * dy + dz * dz)         # (1, tn)

    # --- per-class match mask (unrolled VPU OR over boxes) ---
    # thresh folds radius^2 + class routing + batch correspondence; -1 => never.
    match = []
    for c in range(C):
        hit = d2[0] < thresh_ref[b, c * K + 0]
        for k in range(1, K):
            hit = jnp.logical_or(hit, d2[k] < thresh_ref[b, c * K + k])
        match.append(hit.astype(jnp.float32))          # (1, tn)

    pos_any = match[0]
    for c in range(1, C):
        pos_any = jnp.maximum(pos_any, match[c])
    neg = neg_ref[...]                                 # (1, tn)
    bg = neg * (1.0 - pos_any)                         # negative & not positive
    ign = (1.0 - neg) * (1.0 - pos_any)                # neither

    # --- classification targets: [one-hot classes | background | ignore] ---
    cls_rows = match + [bg, ign]
    cls_block = jnp.concatenate([r[:, None, :] for r in cls_rows], axis=1)
    cls_ref[...] = cls_block.astype(jnp.int32)         # single lane-dense store

    # --- regression targets ---
    # rows c*7+f: f<3 -> match_c * (center_c[f] - xyz[f]); f>=3 -> match_c * const_c[f]
    xyz = (x, y, z)
    reg_rows = []
    for c in range(C):
        mc = match[c]
        for f in range(3):
            reg_rows.append(mc * (regconst_ref[c, f] - xyz[f]))
        for f in range(3, 7):
            reg_rows.append(mc * regconst_ref[c, f])
    reg_block = jnp.concatenate([r[:, None, :] for r in reg_rows], axis=1)
    reg_ref[...] = reg_block                           # single lane-dense store


def refinement_target_assigner(keypoints, boxes, class_ids, box_counts,
                               anchor_sizes, anchor_radii, neg_mask,
                               *, tile_n=None):
    B, N, _ = keypoints.shape
    K = boxes.shape[0]
    C = anchor_sizes.shape[0]
    if tile_n is None:
        # Per-tile VMEM footprint is KB-scale; use the whole row unless huge.
        tile_n = N if (N <= 4096 or N % 2048 != 0) else 2048
    assert N % tile_n == 0
    assert tile_n == N or tile_n % 128 == 0

    box_centers = boxes[:, 0:3]
    box_sizes = boxes[:, 3:6]
    box_angles = boxes[:, 6:7]

    # ---- glue / parameter prep (plain JAX) ----
    kp_t = jnp.transpose(keypoints.astype(jnp.float32), (0, 2, 1))        # (B, 3, N)
    centers = box_centers.astype(jnp.float32)                             # (K, 3)

    # thresh[b, c, k] = radius(class_ids[k])^2 if (class_ids[k] == c and box k
    # belongs to batch b) else -1.0 ; d2 < thresh reproduces dist < radius.
    radii_sq = (anchor_radii[class_ids] ** 2).astype(jnp.float32)         # (K,)
    class_oh = class_ids[:, None] == jnp.arange(C)[None, :]               # (K, C)
    # box_counts must be static Python data (consumed at trace time).
    box_batch = np.repeat(np.arange(B), np.asarray(box_counts))           # (K,)
    bmask = jnp.asarray(box_batch[None, :] == np.arange(B)[:, None])      # (B, K)
    ok = bmask[:, None, :] & jnp.transpose(class_oh)[None, :, :]          # (B, C, K)
    thresh = jnp.where(ok, radii_sq[None, None, :], -1.0).astype(jnp.float32)
    thresh = thresh.reshape(B, C * K)                                     # (B, C*K)

    # Reproduces the original's indexing of box tensors / anchor_sizes by class id.
    reg_const = jnp.concatenate(
        [box_centers[:C],
         (box_sizes[:C] - anchor_sizes) / anchor_sizes,
         box_angles[:C]], axis=-1).astype(jnp.float32)                    # (C, 7)

    neg = neg_mask.reshape(1, N).astype(jnp.float32)                      # (1, N)

    grid = (B, N // tile_n)
    cls_t, reg_t = pl.pallas_call(
        _assigner_kernel,
        out_shape=(jax.ShapeDtypeStruct((B, C + 2, N), jnp.int32),
                   jax.ShapeDtypeStruct((B, C * 7, N), jnp.float32)),
        grid=grid,
        in_specs=[
            pl.BlockSpec(memory_space=pltpu.MemorySpace.SMEM),            # centers
            pl.BlockSpec(memory_space=pltpu.MemorySpace.SMEM),            # thresh
            pl.BlockSpec(memory_space=pltpu.MemorySpace.SMEM),            # reg_const
            pl.BlockSpec((1, 3, tile_n), lambda b, i: (b, 0, i)),         # keypoints
            pl.BlockSpec((1, tile_n), lambda b, i: (0, i)),               # neg mask
        ],
        out_specs=(
            pl.BlockSpec((1, C + 2, tile_n), lambda b, i: (b, 0, i)),
            pl.BlockSpec((1, C * 7, tile_n), lambda b, i: (b, 0, i)),
        ),
        compiler_params=pltpu.CompilerParams(
            dimension_semantics=("parallel", "parallel")),
    )(centers, thresh, reg_const, kp_t, neg)

    cls_out = jnp.transpose(cls_t, (0, 2, 1))                             # (B, N, C+2)
    reg_out = jnp.transpose(reg_t, (0, 2, 1)).reshape(B, N, C, 7)         # (B, N, C, 7)
    return cls_out, reg_out


if __name__ == "__main__":
    B, N, C, M = 2, 128, 3, 8           # batch, keypoints, classes, num negatives
    box_counts = [3, 4]
    K = sum(box_counts)

    key = jax.random.PRNGKey(0)
    k_kp, k_ctr, k_sz, k_ang, k_cls, k_neg = jax.random.split(key, 6)

    keypoints = jax.random.uniform(k_kp, (B, N, 3), jnp.float32, -5.0, 5.0)
    box_centers = jax.random.uniform(k_ctr, (K, 3), jnp.float32, -5.0, 5.0)
    box_sizes = jax.random.uniform(k_sz, (K, 3), jnp.float32, 0.5, 4.0)
    box_angles = jax.random.uniform(k_ang, (K, 1), jnp.float32, -3.14, 3.14)
    boxes = jnp.concatenate([box_centers, box_sizes, box_angles], axis=-1)
    class_ids = jax.random.randint(k_cls, (K,), 0, C)

    # deterministic cfg.ANCHORS params (wlh + radius per class)
    anchor_sizes = jnp.array([[1.6, 3.9, 1.56],
                              [0.6, 0.8, 1.73],
                              [0.6, 1.76, 1.73]], jnp.float32)
    anchor_radii = jnp.array([2.5, 1.5, 2.0], jnp.float32)

    # fill_negatives: random keypoint indices marked background; the original
    # indexing targets_cls[:, inds, -2] = 1 broadcasts the union across batch.
    neg_inds = jax.random.randint(k_neg, (B, M), 0, N)
    neg_mask = jnp.zeros((N,), jnp.float32).at[neg_inds.reshape(-1)].set(1.0)

    cls_t, reg_t = refinement_target_assigner(
        keypoints, boxes, class_ids, box_counts,
        anchor_sizes, anchor_radii, neg_mask)
    jax.block_until_ready((cls_t, reg_t))

    # ---- pure-JAX dense reference for correctness check ----
    # (dist < r) <=> (dist^2 < r^2) for r >= 0, so the sqrt-free form is exact.
    box_batch = np.repeat(np.arange(B), box_counts)
    bmask_ref = jnp.asarray(box_batch[None, :] == np.arange(B)[:, None])   # (B, K)
    diff = keypoints[:, :, None, :] - box_centers[None, None, :, :]
    dist2 = jnp.sum(diff * diff, -1)
    radii_sq = anchor_radii[class_ids] ** 2
    in_rad = (dist2 < radii_sq[None, None, :]) & bmask_ref[:, None, :]
    class_oh = (class_ids[:, None] == jnp.arange(C)[None, :]).astype(jnp.float32)
    match = jnp.einsum('bnk,kc->bnc', in_rad.astype(jnp.float32), class_oh) > 0
    pos_any = jnp.any(match, -1, keepdims=True)
    negb = neg_mask.reshape(1, N, 1) > 0
    ref_cls = jnp.concatenate([match.astype(jnp.int32),
                               (negb & ~pos_any).astype(jnp.int32),
                               (~negb & ~pos_any).astype(jnp.int32)], -1)
    reg_const = jnp.concatenate([box_centers[:C],
                                 (box_sizes[:C] - anchor_sizes) / anchor_sizes,
                                 box_angles[:C]], -1)
    kp7 = jnp.concatenate([keypoints, jnp.zeros((B, N, 4), jnp.float32)], -1)
    ref_reg = match.astype(jnp.float32)[:, :, :, None] * \
        (reg_const[None, None, :, :] - kp7[:, :, None, :])

    assert jnp.array_equal(cls_t, ref_cls), "cls targets mismatch"
    assert jnp.allclose(reg_t, ref_reg, atol=1e-5), "reg targets mismatch"
    # TODO(synk): PyTorch emits int64 cls targets; JAX default config keeps int32.
    print("KERNEL_OK")
</pallas_src>

<mosaic_0001>
module attributes {stable_mosaic.version = 11 : i64} {
  func.func @_assigner_kernel(%arg0: i32, %arg1: i32, %arg2: memref<7x3xf32, #tpu.memory_space<smem>>, %arg3: memref<2x21xf32, #tpu.memory_space<smem>>, %arg4: memref<3x7xf32, #tpu.memory_space<smem>>, %arg5: memref<1x3x128xf32, #tpu.memory_space<vmem>>, %arg6: memref<1x128xf32, #tpu.memory_space<vmem>>, %arg7: memref<1x5x128xi32, #tpu.memory_space<vmem>>, %arg8: memref<1x21x128xf32, #tpu.memory_space<vmem>>) attributes {dimension_semantics = [#tpu.dimension_semantics<parallel>, #tpu.dimension_semantics<parallel>], iteration_bounds = array<i64: 2, 1>, scalar_prefetch = 0 : i64, scratch_operands = 0 : i64, tpu.core_type = #tpu.core_type<tc>, window_params = [{transform_indices = @transform_0, window_bounds = array<i64: 7, 3>}, {transform_indices = @transform_1, window_bounds = array<i64: 2, 21>}, {transform_indices = @transform_2, window_bounds = array<i64: 3, 7>}, {transform_indices = @transform_3, window_bounds = array<i64: 1, 3, 128>}, {transform_indices = @transform_4, window_bounds = array<i64: 1, 128>}, {transform_indices = @transform_5, window_bounds = array<i64: 1, 5, 128>}, {transform_indices = @transform_6, window_bounds = array<i64: 1, 21, 128>}]} {
    %c0 = arith.constant 0 : index
    %c0_0 = arith.constant 0 : index
    %c0_1 = arith.constant 0 : index
    %0 = vector.load %arg5[%c0, %c0_0, %c0_1] : memref<1x3x128xf32, #tpu.memory_space<vmem>>, vector<1x3x128xf32>
    %1 = vector.extract_strided_slice %0 {offsets = [0, 0, 0], sizes = [1, 1, 128], strides = [1, 1, 1]} : vector<1x3x128xf32> to vector<1x1x128xf32>
    %2 = vector.shape_cast %1 : vector<1x1x128xf32> to vector<1x128xf32>
    %3 = vector.extract_strided_slice %0 {offsets = [0, 1, 0], sizes = [1, 1, 128], strides = [1, 1, 1]} : vector<1x3x128xf32> to vector<1x1x128xf32>
    %4 = vector.shape_cast %3 : vector<1x1x128xf32> to vector<1x128xf32>
    %5 = vector.extract_strided_slice %0 {offsets = [0, 2, 0], sizes = [1, 1, 128], strides = [1, 1, 1]} : vector<1x3x128xf32> to vector<1x1x128xf32>
    %6 = vector.shape_cast %5 : vector<1x1x128xf32> to vector<1x128xf32>
    %c0_2 = arith.constant 0 : index
    %c0_3 = arith.constant 0 : index
    %7 = memref.load %arg2[%c0_2, %c0_3] : memref<7x3xf32, #tpu.memory_space<smem>>
    %8 = vector.broadcast %7 : f32 to vector<1x128xf32>
    %9 = arith.subf %2, %8 : vector<1x128xf32>
    %c0_4 = arith.constant 0 : index
    %c1 = arith.constant 1 : index
    %10 = memref.load %arg2[%c0_4, %c1] : memref<7x3xf32, #tpu.memory_space<smem>>
    %11 = vector.broadcast %10 : f32 to vector<1x128xf32>
    %12 = arith.subf %4, %11 : vector<1x128xf32>
    %c0_5 = arith.constant 0 : index
    %c2 = arith.constant 2 : index
    %13 = memref.load %arg2[%c0_5, %c2] : memref<7x3xf32, #tpu.memory_space<smem>>
    %14 = vector.broadcast %13 : f32 to vector<1x128xf32>
    %15 = arith.subf %6, %14 : vector<1x128xf32>
    %16 = arith.mulf %9, %9 : vector<1x128xf32>
    %17 = arith.mulf %12, %12 : vector<1x128xf32>
    %18 = arith.addf %16, %17 : vector<1x128xf32>
    %19 = arith.mulf %15, %15 : vector<1x128xf32>
    %20 = arith.addf %18, %19 : vector<1x128xf32>
    %c1_6 = arith.constant 1 : index
    %c0_7 = arith.constant 0 : index
    %21 = memref.load %arg2[%c1_6, %c0_7] : memref<7x3xf32, #tpu.memory_space<smem>>
    %22 = vector.broadcast %21 : f32 to vector<1x128xf32>
    %23 = arith.subf %2, %22 : vector<1x128xf32>
    %c1_8 = arith.constant 1 : index
    %c1_9 = arith.constant 1 : index
    %24 = memref.load %arg2[%c1_8, %c1_9] : memref<7x3xf32, #tpu.memory_space<smem>>
    %25 = vector.broadcast %24 : f32 to vector<1x128xf32>
    %26 = arith.subf %4, %25 : vector<1x128xf32>
    %c1_10 = arith.constant 1 : index
    %c2_11 = arith.constant 2 : index
    %27 = memref.load %arg2[%c1_10, %c2_11] : memref<7x3xf32, #tpu.memory_space<smem>>
    %28 = vector.broadcast %27 : f32 to vector<1x128xf32>
    %29 = arith.subf %6, %28 : vector<1x128xf32>
    %30 = arith.mulf %23, %23 : vector<1x128xf32>
    %31 = arith.mulf %26, %26 : vector<1x128xf32>
    %32 = arith.addf %30, %31 : vector<1x128xf32>
    %33 = arith.mulf %29, %29 : vector<1x128xf32>
    %34 = arith.addf %32, %33 : vector<1x128xf32>
    %c2_12 = arith.constant 2 : index
    %c0_13 = arith.constant 0 : index
    %35 = memref.load %arg2[%c2_12, %c0_13] : memref<7x3xf32, #tpu.memory_space<smem>>
    %36 = vector.broadcast %35 : f32 to vector<1x128xf32>
    %37 = arith.subf %2, %36 : vector<1x128xf32>
    %c2_14 = arith.constant 2 : index
    %c1_15 = arith.constant 1 : index
    %38 = memref.load %arg2[%c2_14, %c1_15] : memref<7x3xf32, #tpu.memory_space<smem>>
    %39 = vector.broadcast %38 : f32 to vector<1x128xf32>
    %40 = arith.subf %4, %39 : vector<1x128xf32>
    %c2_16 = arith.constant 2 : index
    %c2_17 = arith.constant 2 : index
    %41 = memref.load %arg2[%c2_16, %c2_17] : memref<7x3xf32, #tpu.memory_space<smem>>
    %42 = vector.broadcast %41 : f32 to vector<1x128xf32>
    %43 = arith.subf %6, %42 : vector<1x128xf32>
    %44 = arith.mulf %37, %37 : vector<1x128xf32>
    %45 = arith.mulf %40, %40 : vector<1x128xf32>
    %46 = arith.addf %44, %45 : vector<1x128xf32>
    %47 = arith.mulf %43, %43 : vector<1x128xf32>
    %48 = arith.addf %46, %47 : vector<1x128xf32>
    %c3 = arith.constant 3 : index
    %c0_18 = arith.constant 0 : index
    %49 = memref.load %arg2[%c3, %c0_18] : memref<7x3xf32, #tpu.memory_space<smem>>
    %50 = vector.broadcast %49 : f32 to vector<1x128xf32>
    %51 = arith.subf %2, %50 : vector<1x128xf32>
    %c3_19 = arith.constant 3 : index
    %c1_20 = arith.constant 1 : index
    %52 = memref.load %arg2[%c3_19, %c1_20] : memref<7x3xf32, #tpu.memory_space<smem>>
    %53 = vector.broadcast %52 : f32 to vector<1x128xf32>
    %54 = arith.subf %4, %53 : vector<1x128xf32>
    %c3_21 = arith.constant 3 : index
    %c2_22 = arith.constant 2 : index
    %55 = memref.load %arg2[%c3_21, %c2_22] : memref<7x3xf32, #tpu.memory_space<smem>>
    %56 = vector.broadcast %55 : f32 to vector<1x128xf32>
    %57 = arith.subf %6, %56 : vector<1x128xf32>
    %58 = arith.mulf %51, %51 : vector<1x128xf32>
    %59 = arith.mulf %54, %54 : vector<1x128xf32>
    %60 = arith.addf %58, %59 : vector<1x128xf32>
    %61 = arith.mulf %57, %57 : vector<1x128xf32>
    %62 = arith.addf %60, %61 : vector<1x128xf32>
    %c4 = arith.constant 4 : index
    %c0_23 = arith.constant 0 : index
    %63 = memref.load %arg2[%c4, %c0_23] : memref<7x3xf32, #tpu.memory_space<smem>>
    %64 = vector.broadcast %63 : f32 to vector<1x128xf32>
    %65 = arith.subf %2, %64 : vector<1x128xf32>
    %c4_24 = arith.constant 4 : index
    %c1_25 = arith.constant 1 : index
    %66 = memref.load %arg2[%c4_24, %c1_25] : memref<7x3xf32, #tpu.memory_space<smem>>
    %67 = vector.broadcast %66 : f32 to vector<1x128xf32>
    %68 = arith.subf %4, %67 : vector<1x128xf32>
    %c4_26 = arith.constant 4 : index
    %c2_27 = arith.constant 2 : index
    %69 = memref.load %arg2[%c4_26, %c2_27] : memref<7x3xf32, #tpu.memory_space<smem>>
    %70 = vector.broadcast %69 : f32 to vector<1x128xf32>
    %71 = arith.subf %6, %70 : vector<1x128xf32>
    %72 = arith.mulf %65, %65 : vector<1x128xf32>
    %73 = arith.mulf %68, %68 : vector<1x128xf32>
    %74 = arith.addf %72, %73 : vector<1x128xf32>
    %75 = arith.mulf %71, %71 : vector<1x128xf32>
    %76 = arith.addf %74, %75 : vector<1x128xf32>
    %c5 = arith.constant 5 : index
    %c0_28 = arith.constant 0 : index
    %77 = memref.load %arg2[%c5, %c0_28] : memref<7x3xf32, #tpu.memory_space<smem>>
    %78 = vector.broadcast %77 : f32 to vector<1x128xf32>
    %79 = arith.subf %2, %78 : vector<1x128xf32>
    %c5_29 = arith.constant 5 : index
    %c1_30 = arith.constant 1 : index
    %80 = memref.load %arg2[%c5_29, %c1_30] : memref<7x3xf32, #tpu.memory_space<smem>>
    %81 = vector.broadcast %80 : f32 to vector<1x128xf32>
    %82 = arith.subf %4, %81 : vector<1x128xf32>
    %c5_31 = arith.constant 5 : index
    %c2_32 = arith.constant 2 : index
    %83 = memref.load %arg2[%c5_31, %c2_32] : memref<7x3xf32, #tpu.memory_space<smem>>
    %84 = vector.broadcast %83 : f32 to vector<1x128xf32>
    %85 = arith.subf %6, %84 : vector<1x128xf32>
    %86 = arith.mulf %79, %79 : vector<1x128xf32>
    %87 = arith.mulf %82, %82 : vector<1x128xf32>
    %88 = arith.addf %86, %87 : vector<1x128xf32>
    %89 = arith.mulf %85, %85 : vector<1x128xf32>
    %90 = arith.addf %88, %89 : vector<1x128xf32>
    %c6 = arith.constant 6 : index
    %c0_33 = arith.constant 0 : index
    %91 = memref.load %arg2[%c6, %c0_33] : memref<7x3xf32, #tpu.memory_space<smem>>
    %92 = vector.broadcast %91 : f32 to vector<1x128xf32>
    %93 = arith.subf %2, %92 : vector<1x128xf32>
    %c6_34 = arith.constant 6 : index
    %c1_35 = arith.constant 1 : index
    %94 = memref.load %arg2[%c6_34, %c1_35] : memref<7x3xf32, #tpu.memory_space<smem>>
    %95 = vector.broadcast %94 : f32 to vector<1x128xf32>
    %96 = arith.subf %4, %95 : vector<1x128xf32>
    %c6_36 = arith.constant 6 : index
    %c2_37 = arith.constant 2 : index
    %97 = memref.load %arg2[%c6_36, %c2_37] : memref<7x3xf32, #tpu.memory_space<smem>>
    %98 = vector.broadcast %97 : f32 to vector<1x128xf32>
    %99 = arith.subf %6, %98 : vector<1x128xf32>
    %100 = arith.mulf %93, %93 : vector<1x128xf32>
    %101 = arith.mulf %96, %96 : vector<1x128xf32>
    %102 = arith.addf %100, %101 : vector<1x128xf32>
    %103 = arith.mulf %99, %99 : vector<1x128xf32>
    %104 = arith.addf %102, %103 : vector<1x128xf32>
    %105 = arith.index_cast %arg0 : i32 to index
    %c0_38 = arith.constant 0 : index
    %106 = memref.load %arg3[%105, %c0_38] : memref<2x21xf32, #tpu.memory_space<smem>>
    %107 = vector.broadcast %106 : f32 to vector<1x128xf32>
    %108 = arith.cmpf olt, %20, %107 : vector<1x128xf32>
    %109 = arith.index_cast %arg0 : i32 to index
    %c1_39 = arith.constant 1 : index
    %110 = memref.load %arg3[%109, %c1_39] : memref<2x21xf32, #tpu.memory_space<smem>>
    %111 = vector.broadcast %110 : f32 to vector<1x128xf32>
    %112 = arith.cmpf olt, %34, %111 : vector<1x128xf32>
    %113 = arith.ori %108, %112 : vector<1x128xi1>
    %114 = arith.index_cast %arg0 : i32 to index
    %c2_40 = arith.constant 2 : index
    %115 = memref.load %arg3[%114, %c2_40] : memref<2x21xf32, #tpu.memory_space<smem>>
    %116 = vector.broadcast %115 : f32 to vector<1x128xf32>
    %117 = arith.cmpf olt, %48, %116 : vector<1x128xf32>
    %118 = arith.ori %113, %117 : vector<1x128xi1>
    %119 = arith.index_cast %arg0 : i32 to index
    %c3_41 = arith.constant 3 : index
    %120 = memref.load %arg3[%119, %c3_41] : memref<2x21xf32, #tpu.memory_space<smem>>
    %121 = vector.broadcast %120 : f32 to vector<1x128xf32>
    %122 = arith.cmpf olt, %62, %121 : vector<1x128xf32>
    %123 = arith.ori %118, %122 : vector<1x128xi1>
    %124 = arith.index_cast %arg0 : i32 to index
    %c4_42 = arith.constant 4 : index
    %125 = memref.load %arg3[%124, %c4_42] : memref<2x21xf32, #tpu.memory_space<smem>>
    %126 = vector.broadcast %125 : f32 to vector<1x128xf32>
    %127 = arith.cmpf olt, %76, %126 : vector<1x128xf32>
    %128 = arith.ori %123, %127 : vector<1x128xi1>
    %129 = arith.index_cast %arg0 : i32 to index
    %c5_43 = arith.constant 5 : index
    %130 = memref.load %arg3[%129, %c5_43] : memref<2x21xf32, #tpu.memory_space<smem>>
    %131 = vector.broadcast %130 : f32 to vector<1x128xf32>
    %132 = arith.cmpf olt, %90, %131 : vector<1x128xf32>
    %133 = arith.ori %128, %132 : vector<1x128xi1>
    %134 = arith.index_cast %arg0 : i32 to index
    %c6_44 = arith.constant 6 : index
    %135 = memref.load %arg3[%134, %c6_44] : memref<2x21xf32, #tpu.memory_space<smem>>
    %136 = vector.broadcast %135 : f32 to vector<1x128xf32>
    %137 = arith.cmpf olt, %104, %136 : vector<1x128xf32>
    %138 = arith.ori %133, %137 : vector<1x128xi1>
    %139 = arith.extui %138 : vector<1x128xi1> to vector<1x128xi32>
    %140 = arith.sitofp %139 : vector<1x128xi32> to vector<1x128xf32>
    %141 = arith.index_cast %arg0 : i32 to index
    %c7 = arith.constant 7 : index
    %142 = memref.load %arg3[%141, %c7] : memref<2x21xf32, #tpu.memory_space<smem>>
    %143 = vector.broadcast %142 : f32 to vector<1x128xf32>
    %144 = arith.cmpf olt, %20, %143 : vector<1x128xf32>
    %145 = arith.index_cast %arg0 : i32 to index
    %c8 = arith.constant 8 : index
    %146 = memref.load %arg3[%145, %c8] : memref<2x21xf32, #tpu.memory_space<smem>>
    %147 = vector.broadcast %146 : f32 to vector<1x128xf32>
    %148 = arith.cmpf olt, %34, %147 : vector<1x128xf32>
    %149 = arith.ori %144, %148 : vector<1x128xi1>
    %150 = arith.index_cast %arg0 : i32 to index
    %c9 = arith.constant 9 : index
    %151 = memref.load %arg3[%150, %c9] : memref<2x21xf32, #tpu.memory_space<smem>>
    %152 = vector.broadcast %151 : f32 to vector<1x128xf32>
    %153 = arith.cmpf olt, %48, %152 : vector<1x128xf32>
    %154 = arith.ori %149, %153 : vector<1x128xi1>
    %155 = arith.index_cast %arg0 : i32 to index
    %c10 = arith.constant 10 : index
    %156 = memref.load %arg3[%155, %c10] : memref<2x21xf32, #tpu.memory_space<smem>>
    %157 = vector.broadcast %156 : f32 to vector<1x128xf32>
    %158 = arith.cmpf olt, %62, %157 : vector<1x128xf32>
    %159 = arith.ori %154, %158 : vector<1x128xi1>
    %160 = arith.index_cast %arg0 : i32 to index
    %c11 = arith.constant 11 : index
    %161 = memref.load %arg3[%160, %c11] : memref<2x21xf32, #tpu.memory_space<smem>>
    %162 = vector.broadcast %161 : f32 to vector<1x128xf32>
    %163 = arith.cmpf olt, %76, %162 : vector<1x128xf32>
    %164 = arith.ori %159, %163 : vector<1x128xi1>
    %165 = arith.index_cast %arg0 : i32 to index
    %c12 = arith.constant 12 : index
    %166 = memref.load %arg3[%165, %c12] : memref<2x21xf32, #tpu.memory_space<smem>>
    %167 = vector.broadcast %166 : f32 to vector<1x128xf32>
    %168 = arith.cmpf olt, %90, %167 : vector<1x128xf32>
    %169 = arith.ori %164, %168 : vector<1x128xi1>
    %170 = arith.index_cast %arg0 : i32 to index
    %c13 = arith.constant 13 : index
    %171 = memref.load %arg3[%170, %c13] : memref<2x21xf32, #tpu.memory_space<smem>>
    %172 = vector.broadcast %171 : f32 to vector<1x128xf32>
    %173 = arith.cmpf olt, %104, %172 : vector<1x128xf32>
    %174 = arith.ori %169, %173 : vector<1x128xi1>
    %175 = arith.extui %174 : vector<1x128xi1> to vector<1x128xi32>
    %176 = arith.sitofp %175 : vector<1x128xi32> to vector<1x128xf32>
    %177 = arith.index_cast %arg0 : i32 to index
    %c14 = arith.constant 14 : index
    %178 = memref.load %arg3[%177, %c14] : memref<2x21xf32, #tpu.memory_space<smem>>
    %179 = vector.broadcast %178 : f32 to vector<1x128xf32>
    %180 = arith.cmpf olt, %20, %179 : vector<1x128xf32>
    %181 = arith.index_cast %arg0 : i32 to index
    %c15 = arith.constant 15 : index
    %182 = memref.load %arg3[%181, %c15] : memref<2x21xf32, #tpu.memory_space<smem>>
    %183 = vector.broadcast %182 : f32 to vector<1x128xf32>
    %184 = arith.cmpf olt, %34, %183 : vector<1x128xf32>
    %185 = arith.ori %180, %184 : vector<1x128xi1>
    %186 = arith.index_cast %arg0 : i32 to index
    %c16 = arith.constant 16 : index
    %187 = memref.load %arg3[%186, %c16] : memref<2x21xf32, #tpu.memory_space<smem>>
    %188 = vector.broadcast %187 : f32 to vector<1x128xf32>
    %189 = arith.cmpf olt, %48, %188 : vector<1x128xf32>
    %190 = arith.ori %185, %189 : vector<1x128xi1>
    %191 = arith.index_cast %arg0 : i32 to index
    %c17 = arith.constant 17 : index
    %192 = memref.load %arg3[%191, %c17] : memref<2x21xf32, #tpu.memory_space<smem>>
    %193 = vector.broadcast %192 : f32 to vector<1x128xf32>
    %194 = arith.cmpf olt, %62, %193 : vector<1x128xf32>
    %195 = arith.ori %190, %194 : vector<1x128xi1>
    %196 = arith.index_cast %arg0 : i32 to index
    %c18 = arith.constant 18 : index
    %197 = memref.load %arg3[%196, %c18] : memref<2x21xf32, #tpu.memory_space<smem>>
    %198 = vector.broadcast %197 : f32 to vector<1x128xf32>
    %199 = arith.cmpf olt, %76, %198 : vector<1x128xf32>
    %200 = arith.ori %195, %199 : vector<1x128xi1>
    %201 = arith.index_cast %arg0 : i32 to index
    %c19 = arith.constant 19 : index
    %202 = memref.load %arg3[%201, %c19] : memref<2x21xf32, #tpu.memory_space<smem>>
    %203 = vector.broadcast %202 : f32 to vector<1x128xf32>
    %204 = arith.cmpf olt, %90, %203 : vector<1x128xf32>
    %205 = arith.ori %200, %204 : vector<1x128xi1>
    %206 = arith.index_cast %arg0 : i32 to index
    %c20 = arith.constant 20 : index
    %207 = memref.load %arg3[%206, %c20] : memref<2x21xf32, #tpu.memory_space<smem>>
    %208 = vector.broadcast %207 : f32 to vector<1x128xf32>
    %209 = arith.cmpf olt, %104, %208 : vector<1x128xf32>
    %210 = arith.ori %205, %209 : vector<1x128xi1>
    %211 = arith.extui %210 : vector<1x128xi1> to vector<1x128xi32>
    %212 = arith.sitofp %211 : vector<1x128xi32> to vector<1x128xf32>
    %213 = arith.maximumf %140, %176 : vector<1x128xf32>
    %214 = arith.maximumf %213, %212 : vector<1x128xf32>
    %c0_45 = arith.constant 0 : index
    %c0_46 = arith.constant 0 : index
    %215 = vector.load %arg6[%c0_45, %c0_46] : memref<1x128xf32, #tpu.memory_space<vmem>>, vector<1x128xf32>
    %cst = arith.constant 1.000000e+00 : f32
    %216 = vector.broadcast %cst : f32 to vector<1x128xf32>
    %217 = arith.subf %216, %214 : vector<1x128xf32>
    %218 = arith.mulf %215, %217 : vector<1x128xf32>
    %cst_47 = arith.constant 1.000000e+00 : f32
    %219 = vector.broadcast %cst_47 : f32 to vector<1x128xf32>
    %220 = arith.subf %219, %215 : vector<1x128xf32>
    %cst_48 = arith.constant 1.000000e+00 : f32
    %221 = vector.broadcast %cst_48 : f32 to vector<1x128xf32>
    %222 = arith.subf %221, %214 : vector<1x128xf32>
    %223 = arith.mulf %220, %222 : vector<1x128xf32>
    %224 = vector.shape_cast %140 : vector<1x128xf32> to vector<1x1x128xf32>
    %225 = vector.shape_cast %176 : vector<1x128xf32> to vector<1x1x128xf32>
    %226 = vector.shape_cast %212 : vector<1x128xf32> to vector<1x1x128xf32>
    %227 = vector.shape_cast %218 : vector<1x128xf32> to vector<1x1x128xf32>
    %228 = vector.shape_cast %223 : vector<1x128xf32> to vector<1x1x128xf32>
    %229 = tpu.concatenate %224, %225, %226, %227, %228 in 1 : vector<1x1x128xf32>, vector<1x1x128xf32>, vector<1x1x128xf32>, vector<1x1x128xf32>, vector<1x1x128xf32> -> vector<1x5x128xf32>
    %230 = arith.fptosi %229 : vector<1x5x128xf32> to vector<1x5x128xi32>
    %c0_49 = arith.constant 0 : index
    %c0_50 = arith.constant 0 : index
    %c0_51 = arith.constant 0 : index
    %231 = vector.load %arg7[%c0_49, %c0_50, %c0_51] : memref<1x5x128xi32, #tpu.memory_space<vmem>>, vector<1x5x128xi32>
    tpu.vector_store %arg7[%c0_49, %c0_50, %c0_51], %230 {strides = array<i32>} : memref<1x5x128xi32, #tpu.memory_space<vmem>>, vector<1x5x128xi32>,
    %c0_52 = arith.constant 0 : index
    %c0_53 = arith.constant 0 : index
    %232 = memref.load %arg4[%c0_52, %c0_53] : memref<3x7xf32, #tpu.memory_space<smem>>
    %233 = vector.broadcast %232 : f32 to vector<1x128xf32>
    %234 = arith.subf %233, %2 : vector<1x128xf32>
    %235 = arith.mulf %140, %234 : vector<1x128xf32>
    %c0_54 = arith.constant 0 : index
    %c1_55 = arith.constant 1 : index
    %236 = memref.load %arg4[%c0_54, %c1_55] : memref<3x7xf32, #tpu.memory_space<smem>>
    %237 = vector.broadcast %236 : f32 to vector<1x128xf32>
    %238 = arith.subf %237, %4 : vector<1x128xf32>
    %239 = arith.mulf %140, %238 : vector<1x128xf32>
    %c0_56 = arith.constant 0 : index
    %c2_57 = arith.constant 2 : index
    %240 = memref.load %arg4[%c0_56, %c2_57] : memref<3x7xf32, #tpu.memory_space<smem>>
    %241 = vector.broadcast %240 : f32 to vector<1x128xf32>
    %242 = arith.subf %241, %6 : vector<1x128xf32>
    %243 = arith.mulf %140, %242 : vector<1x128xf32>
    %c0_58 = arith.constant 0 : index
    %c3_59 = arith.constant 3 : index
    %244 = memref.load %arg4[%c0_58, %c3_59] : memref<3x7xf32, #tpu.memory_space<smem>>
    %245 = vector.broadcast %244 : f32 to vector<1x128xf32>
    %246 = arith.mulf %140, %245 : vector<1x128xf32>
    %c0_60 = arith.constant 0 : index
    %c4_61 = arith.constant 4 : index
    %247 = memref.load %arg4[%c0_60, %c4_61] : memref<3x7xf32, #tpu.memory_space<smem>>
    %248 = vector.broadcast %247 : f32 to vector<1x128xf32>
    %249 = arith.mulf %140, %248 : vector<1x128xf32>
    %c0_62 = arith.constant 0 : index
    %c5_63 = arith.constant 5 : index
    %250 = memref.load %arg4[%c0_62, %c5_63] : memref<3x7xf32, #tpu.memory_space<smem>>
    %251 = vector.broadcast %250 : f32 to vector<1x128xf32>
    %252 = arith.mulf %140, %251 : vector<1x128xf32>
    %c0_64 = arith.constant 0 : index
    %c6_65 = arith.constant 6 : index
    %253 = memref.load %arg4[%c0_64, %c6_65] : memref<3x7xf32, #tpu.memory_space<smem>>
    %254 = vector.broadcast %253 : f32 to vector<1x128xf32>
    %255 = arith.mulf %140, %254 : vector<1x128xf32>
    %c1_66 = arith.constant 1 : index
    %c0_67 = arith.constant 0 : index
    %256 = memref.load %arg4[%c1_66, %c0_67] : memref<3x7xf32, #tpu.memory_space<smem>>
    %257 = vector.broadcast %256 : f32 to vector<1x128xf32>
    %258 = arith.subf %257, %2 : vector<1x128xf32>
    %259 = arith.mulf %176, %258 : vector<1x128xf32>
    %c1_68 = arith.constant 1 : index
    %c1_69 = arith.constant 1 : index
    %260 = memref.load %arg4[%c1_68, %c1_69] : memref<3x7xf32, #tpu.memory_space<smem>>
    %261 = vector.broadcast %260 : f32 to vector<1x128xf32>
    %262 = arith.subf %261, %4 : vector<1x128xf32>
    %263 = arith.mulf %176, %262 : vector<1x128xf32>
    %c1_70 = arith.constant 1 : index
    %c2_71 = arith.constant 2 : index
    %264 = memref.load %arg4[%c1_70, %c2_71] : memref<3x7xf32, #tpu.memory_space<smem>>
    %265 = vector.broadcast %264 : f32 to vector<1x128xf32>
    %266 = arith.subf %265, %6 : vector<1x128xf32>
    %267 = arith.mulf %176, %266 : vector<1x128xf32>
    %c1_72 = arith.constant 1 : index
    %c3_73 = arith.constant 3 : index
    %268 = memref.load %arg4[%c1_72, %c3_73] : memref<3x7xf32, #tpu.memory_space<smem>>
    %269 = vector.broadcast %268 : f32 to vector<1x128xf32>
    %270 = arith.mulf %176, %269 : vector<1x128xf32>
    %c1_74 = arith.constant 1 : index
    %c4_75 = arith.constant 4 : index
    %271 = memref.load %arg4[%c1_74, %c4_75] : memref<3x7xf32, #tpu.memory_space<smem>>
    %272 = vector.broadcast %271 : f32 to vector<1x128xf32>
    %273 = arith.mulf %176, %272 : vector<1x128xf32>
    %c1_76 = arith.constant 1 : index
    %c5_77 = arith.constant 5 : index
    %274 = memref.load %arg4[%c1_76, %c5_77] : memref<3x7xf32, #tpu.memory_space<smem>>
    %275 = vector.broadcast %274 : f32 to vector<1x128xf32>
    %276 = arith.mulf %176, %275 : vector<1x128xf32>
    %c1_78 = arith.constant 1 : index
    %c6_79 = arith.constant 6 : index
    %277 = memref.load %arg4[%c1_78, %c6_79] : memref<3x7xf32, #tpu.memory_space<smem>>
    %278 = vector.broadcast %277 : f32 to vector<1x128xf32>
    %279 = arith.mulf %176, %278 : vector<1x128xf32>
    %c2_80 = arith.constant 2 : index
    %c0_81 = arith.constant 0 : index
    %280 = memref.load %arg4[%c2_80, %c0_81] : memref<3x7xf32, #tpu.memory_space<smem>>
    %281 = vector.broadcast %280 : f32 to vector<1x128xf32>
    %282 = arith.subf %281, %2 : vector<1x128xf32>
    %283 = arith.mulf %212, %282 : vector<1x128xf32>
    %c2_82 = arith.constant 2 : index
    %c1_83 = arith.constant 1 : index
    %284 = memref.load %arg4[%c2_82, %c1_83] : memref<3x7xf32, #tpu.memory_space<smem>>
    %285 = vector.broadcast %284 : f32 to vector<1x128xf32>
    %286 = arith.subf %285, %4 : vector<1x128xf32>
    %287 = arith.mulf %212, %286 : vector<1x128xf32>
    %c2_84 = arith.constant 2 : index
    %c2_85 = arith.constant 2 : index
    %288 = memref.load %arg4[%c2_84, %c2_85] : memref<3x7xf32, #tpu.memory_space<smem>>
    %289 = vector.broadcast %288 : f32 to vector<1x128xf32>
    %290 = arith.subf %289, %6 : vector<1x128xf32>
    %291 = arith.mulf %212, %290 : vector<1x128xf32>
    %c2_86 = arith.constant 2 : index
    %c3_87 = arith.constant 3 : index
    %292 = memref.load %arg4[%c2_86, %c3_87] : memref<3x7xf32, #tpu.memory_space<smem>>
    %293 = vector.broadcast %292 : f32 to vector<1x128xf32>
    %294 = arith.mulf %212, %293 : vector<1x128xf32>
    %c2_88 = arith.constant 2 : index
    %c4_89 = arith.constant 4 : index
    %295 = memref.load %arg4[%c2_88, %c4_89] : memref<3x7xf32, #tpu.memory_space<smem>>
    %296 = vector.broadcast %295 : f32 to vector<1x128xf32>
    %297 = arith.mulf %212, %296 : vector<1x128xf32>
    %c2_90 = arith.constant 2 : index
    %c5_91 = arith.constant 5 : index
    %298 = memref.load %arg4[%c2_90, %c5_91] : memref<3x7xf32, #tpu.memory_space<smem>>
    %299 = vector.broadcast %298 : f32 to vector<1x128xf32>
    %300 = arith.mulf %212, %299 : vector<1x128xf32>
    %c2_92 = arith.constant 2 : index
    %c6_93 = arith.constant 6 : index
    %301 = memref.load %arg4[%c2_92, %c6_93] : memref<3x7xf32, #tpu.memory_space<smem>>
    %302 = vector.broadcast %301 : f32 to vector<1x128xf32>
    %303 = arith.mulf %212, %302 : vector<1x128xf32>
    %304 = vector.shape_cast %235 : vector<1x128xf32> to vector<1x1x128xf32>
    %305 = vector.shape_cast %239 : vector<1x128xf32> to vector<1x1x128xf32>
    %306 = vector.shape_cast %243 : vector<1x128xf32> to vector<1x1x128xf32>
    %307 = vector.shape_cast %246 : vector<1x128xf32> to vector<1x1x128xf32>
    %308 = vector.shape_cast %249 : vector<1x128xf32> to vector<1x1x128xf32>
    %309 = vector.shape_cast %252 : vector<1x128xf32> to vector<1x1x128xf32>
    %310 = vector.shape_cast %255 : vector<1x128xf32> to vector<1x1x128xf32>
    %311 = vector.shape_cast %259 : vector<1x128xf32> to vector<1x1x128xf32>
    %312 = vector.shape_cast %263 : vector<1x128xf32> to vector<1x1x128xf32>
    %313 = vector.shape_cast %267 : vector<1x128xf32> to vector<1x1x128xf32>
    %314 = vector.shape_cast %270 : vector<1x128xf32> to vector<1x1x128xf32>
    %315 = vector.shape_cast %273 : vector<1x128xf32> to vector<1x1x128xf32>
    %316 = vector.shape_cast %276 : vector<1x128xf32> to vector<1x1x128xf32>
    %317 = vector.shape_cast %279 : vector<1x128xf32> to vector<1x1x128xf32>
    %318 = vector.shape_cast %283 : vector<1x128xf32> to vector<1x1x128xf32>
    %319 = vector.shape_cast %287 : vector<1x128xf32> to vector<1x1x128xf32>
    %320 = vector.shape_cast %291 : vector<1x128xf32> to vector<1x1x128xf32>
    %321 = vector.shape_cast %294 : vector<1x128xf32> to vector<1x1x128xf32>
    %322 = vector.shape_cast %297 : vector<1x128xf32> to vector<1x1x128xf32>
    %323 = vector.shape_cast %300 : vector<1x128xf32> to vector<1x1x128xf32>
    %324 = vector.shape_cast %303 : vector<1x128xf32> to vector<1x1x128xf32>
    %325 = tpu.concatenate %304, %305, %306, %307, %308, %309, %310, %311, %312, %313, %314, %315, %316, %317, %318, %319 in 1 : vector<1x1x128xf32>, vector<1x1x128xf32>, vector<1x1x128xf32>, vector<1x1x128xf32>, vector<1x1x128xf32>, vector<1x1x128xf32>, vector<1x1x128xf32>, vector<1x1x128xf32>, vector<1x1x128xf32>, vector<1x1x128xf32>, vector<1x1x128xf32>, vector<1x1x128xf32>, vector<1x1x128xf32>, vector<1x1x128xf32>, vector<1x1x128xf32>, vector<1x1x128xf32> -> vector<1x16x128xf32>
    %326 = tpu.concatenate %320, %321, %322, %323, %324 in 1 : vector<1x1x128xf32>, vector<1x1x128xf32>, vector<1x1x128xf32>, vector<1x1x128xf32>, vector<1x1x128xf32> -> vector<1x5x128xf32>
    %327 = tpu.concatenate %325, %326 in 1 : vector<1x16x128xf32>, vector<1x5x128xf32> -> vector<1x21x128xf32>
    %c0_94 = arith.constant 0 : index
    %c0_95 = arith.constant 0 : index
    %c0_96 = arith.constant 0 : index
    %328 = vector.load %arg8[%c0_94, %c0_95, %c0_96] : memref<1x21x128xf32, #tpu.memory_space<vmem>>, vector<1x21x128xf32>
    tpu.vector_store %arg8[%c0_94, %c0_95, %c0_96], %327 {strides = array<i32>} : memref<1x21x128xf32, #tpu.memory_space<vmem>>, vector<1x21x128xf32>,
    return
  }
  func.func @transform_0(%arg0: i32, %arg1: i32) -> (i32, i32) {
    %c0_i32 = arith.constant 0 : i32
    %c0_i32_0 = arith.constant 0 : i32
    %c0_i32_1 = arith.constant 0 : i32
    return %c0_i32, %c0_i32_0 : i32, i32
  }
  func.func @transform_1(%arg0: i32, %arg1: i32) -> (i32, i32) {
    %c0_i32 = arith.constant 0 : i32
    %c0_i32_0 = arith.constant 0 : i32
    %c0_i32_1 = arith.constant 0 : i32
    return %c0_i32, %c0_i32_0 : i32, i32
  }
  func.func @transform_2(%arg0: i32, %arg1: i32) -> (i32, i32) {
    %c0_i32 = arith.constant 0 : i32
    %c0_i32_0 = arith.constant 0 : i32
    %c0_i32_1 = arith.constant 0 : i32
    return %c0_i32, %c0_i32_0 : i32, i32
  }
  func.func @transform_3(%arg0: i32, %arg1: i32) -> (i32, i32, i32) {
    %c0_i32 = arith.constant 0 : i32
    %c0_i32_0 = arith.constant 0 : i32
    return %arg0, %c0_i32, %arg1 : i32, i32, i32
  }
  func.func @transform_4(%arg0: i32, %arg1: i32) -> (i32, i32) {
    %c0_i32 = arith.constant 0 : i32
    %c0_i32_0 = arith.constant 0 : i32
    return %c0_i32, %arg1 : i32, i32
  }
  func.func @transform_5(%arg0: i32, %arg1: i32) -> (i32, i32, i32) {
    %c0_i32 = arith.constant 0 : i32
    %c0_i32_0 = arith.constant 0 : i32
    return %arg0, %c0_i32, %arg1 : i32, i32, i32
  }
  func.func @transform_6(%arg0: i32, %arg1: i32) -> (i32, i32, i32) {
    %c0_i32 = arith.constant 0 : i32
    %c0_i32_0 = arith.constant 0 : i32
    return %arg0, %c0_i32, %arg1 : i32, i32, i32
  }
}

</mosaic_0001>

<bundles_post_ra>
// kernel: tpu_custom_call.1
= control target key start
LH: loop header
LB: loop body
LE: loop exit
PB: predicated region body
PF: predicated region fallthrough
CT: control target
= control target key end

     0   :  { %12 = vsyncpa [#allocation3], 0  ;;  %s1654_s0 = inlined_call_operand.vmem [shape: f32[7,3], index: 0, kind: input, shape index: {}]   ;;  %s1655_s1 = inlined_call_operand.vmem [shape: f32[2,21], index: 1, kind: input, shape index: {}]   ;;  %s1656_s2 = inlined_call_operand.vmem [shape: f32[3,7], index: 2, kind: input, shape index: {}]   ;;  %s1657_s3 = inlined_call_operand.vmem [shape: f32[2,3,128], index: 3, kind: input, shape index: {}]   ;;  %s1658_s4 = inlined_call_operand.vmem [shape: f32[1,128], index: 4, kind: input, shape index: {}]   ;;  %s1659_s5 = inlined_call_operand.vmem [shape: s32[2,5,128], index: 5, kind: output, shape index: {0}]   ;;  %s1660_s6 = inlined_call_operand.vmem [shape: f32[2,21,128], index: 6, kind: output, shape index: {1}]  }
   0x1   :  { %13 = vsyncpa [#allocation5], 0  ;;  %s1202_s21 = smov 0   ;;  %s1204_s22 = smov 0  }
   0x2   :  { %s1206_s23 = smov 0  }
   0x3 LB: > { %s231_s26 = sshll.u32 %s1655_s1, 4  ;;  %s963_s27 = sadd.s32 4294967295, %s1161_s23   ;;  %s1161_s23 = sphi %s1206_s23, %s19_s23   ;;  %s1157_s22 = sphi %s1204_s22, %s1680_s22   ;;  %s1153_s21 = sphi %s1202_s21, %s1679_s21   ;;  %s232_s26 = int_to_ptr.vmem [resolvable:$true] %s231_s26 }
   0x4   : > { %p965_p0 = scmp.ge.s32.totalorder %s1161_s23, 1  ;;  %p209_p1 = scmp.lt.s32.totalorder %s1161_s23, 3 }
   0x5   : > { %p1223_p2 = scmp.eq.s32.totalorder %s963_s27, 0  ;;  %s31_s30 = sadd.s32 1, %s1157_s22 }
   0x6   : > { %p1227_p3 = pnand %p965_p0, %p209_p1  ;;  %s221_s9 = sshll.u32 %s1654_s0, 4  ;;  %s222_s9 = int_to_ptr.vmem [resolvable:$true] %s221_s9 }
   0x7   : > { %p33_p6 = scmp.ge.s32.totalorder %s31_s30, 2  ;;  %s241_s12 = sshll.u32 %s1656_s2, 4  ;;  %s242_s12 = int_to_ptr.vmem [resolvable:$true] %s241_s12 }
   0x8   : > { %p1042_p4 = pneg %p1227_p3  ;;  %s1163_s13 = smov [#allocation4]  }
   0x9   : > { %s1682_s30 = smov (%p33_p6, %s31_s30), 0  ;;  %s1164_s14 = smov [#allocation2]  }
   0xa   : > { %p1043_p5 = pnand %p1223_p2, %p1042_p4  ;;  %s1165_s15 = smov [#allocation6]  }
   0xb   : > { %270 = sbr.rel (%p1227_p3) target bundleno = 103 (0x67), region = 40 }
   0xc   : > { %1048 = dma.vmem_to_smem (!%p1043_p5), %s232_s26, 32, %s1163_s13, [#allocation5]  }
   0xd   : > { %1045 = dma.vmem_to_smem (!%p1043_p5), %s222_s9, 128, %s1164_s14, [#allocation3]  }
   0xe   : > { %1051 = dma.vmem_to_smem (!%p1043_p5), %s242_s12, 64, %s1165_s15, [#allocation5]  }
  0x10   : > { %1144 = dma.done.wait (%p1223_p2), [#allocation3], 128  }
  0x11   : > { %1146 = vsyncadd (%p1223_p2), [#allocation3], 4294967168 }
  0x12   : > { %1148 = dma.done.wait (%p1223_p2), [#allocation5], 96  }
  0x13   : > { %1150 = vsyncadd (%p1223_p2), [#allocation5], 4294967200 }
  0x14   : > { %287 = sfence }
  0x15   : > { %p327_p7 = scmp.lt.s32.totalorder %s1153_s21, 1  ;;  %s353_s16 = sld [smem:[#allocation2]] }
  0x16   : > { %s978_s17 = sld [smem:[#allocation2 + $0x1]] }
  0x17   : > { %s1256_s18 = scalar_select %p327_p7, %s1153_s21, 1 }
  0x18   : > { %s979_s19 = sld [smem:[#allocation2 + $0x2]] }
  0x19   : > { %s975_s20 = sshll.u32 %s1256_s18, 2  ;;  %s980_s27 = sld [smem:[#allocation2 + $0x80]] }
  0x1a   : > { %s333_s26 = scalar_lea.vmem %s1657_s3, %s975_s20  ;;  %s981_s28 = sld [smem:[#allocation2 + $0x81]] }
  0x1b   : > { %v1262_v0 = vld [vmem:[%s333_s26] sm:$0x7]  ;;  %v354_v1 = vstv %s353_s16  ;;  %s982_s29 = sld [smem:[#allocation2 + $0x82]] }
  0x1c   : > { %v355_v2 = vsub.f32 %v1262_v0, %v354_v1  ;;  %v357_v3 = vstv %s978_s17  ;;  %s983_s7 = sld [smem:[#allocation2 + $0x100]] }
  0x1d   : > { %v358_v4 = vsub.f32 %v1262_v0, %v357_v3  ;;  %s984_s8 = sld [smem:[#allocation2 + $0x101]] }
  0x1e   : > { %v360_v5 = vstv %s979_s19  ;;  %v362_v8 = vmul.f32 %v355_v2, %v355_v2  ;;  %s985_s9 = sld [smem:[#allocation2 + $0x102]]  ;;  %s1290_s19 = sshll.u32 %s1153_s21, 7 }
  0x1f   : > { %v361_v6 = vsub.f32 %v1262_v0, %v360_v5  ;;  %v363_v7 = vmul.f32 %v358_v4, %v358_v4  ;;  %v374_v10 = vstv %s980_s27  ;;  %s986_s10 = sld [smem:[#allocation2 + $0x180]]  ;;  %s497_s25 = sadd.s32 1, %s1290_s19 }
  0x20   : > { %v375_v12 = vsub.f32 %v1262_v0, %v374_v10  ;;  %v377_v13 = vstv %s981_s28  ;;  %s1268_s11 = sld [smem:[#allocation2 + $0x181]]  ;;  %s502_s27 = sadd.s32 2, %s1290_s19 }
  0x21   : > { %v365_v9 = vrot.slane %v363_v7, 1  ;;  %v368_v11 = vmul.f32 %v361_v6, %v361_v6  ;;  %v378_v14 = vsub.f32 %v1262_v0, %v377_v13  ;;  %v380_v15 = vstv %s982_s29  ;;  %s1271_s12 = sld [smem:[#allocation2 + $0x182]]  ;;  %s507_s29 = sadd.s32 3, %s1290_s19 }
  0x22   : > { %v381_v17 = vsub.f32 %v1262_v0, %v380_v15  ;;  %v394_v18 = vstv %s983_s7  ;;  %s1274_s13 = sld [smem:[#allocation2 + $0x200]]  ;;  %v382_v19 = vmul.f32 %v375_v12, %v375_v12 }
  0x23   : > { %v367_v16 = vadd.f32 %v365_v9, %v362_v8  ;;  %v383_v20 = vmul.f32 %v378_v14, %v378_v14  ;;  %v395_v21 = vsub.f32 %v1262_v0, %v394_v18  ;;  %v397_v22 = vstv %s984_s8  ;;  %s1277_s14 = sld [smem:[#allocation2 + $0x201]]  ;;  %s512_s8 = sadd.s32 4, %s1290_s19 }
  0x24   : > { %v370_v23 = vrot.slane %v368_v11, 2  ;;  %v388_v24 = vmul.f32 %v381_v17, %v381_v17  ;;  %v398_v25 = vsub.f32 %v1262_v0, %v397_v22  ;;  %v400_v26 = vstv %s985_s9  ;;  %s1280_s15 = sld [smem:[#allocation2 + $0x202]] }
  0x25   : > { %v385_v27 = vrot.slane %v383_v20, 1  ;;  %v401_v28 = vsub.f32 %v1262_v0, %v400_v26  ;;  %v402_v29 = vmul.f32 %v395_v21, %v395_v21  ;;  %v414_v30 = vstv %s986_s10  ;;  %s1283_s16 = sld [smem:[#allocation2 + $0x280]]  ;;  %s517_s10 = sadd.s32 5, %s1290_s19 }
  0x26   : > { %v390_v31 = vrot.slane %v388_v24, 2  ;;  %v403_v32 = vmul.f32 %v398_v25, %v398_v25  ;;  %v415_v33 = vsub.f32 %v1262_v0, %v414_v30  ;;  %v417_v34 = vstv %s1268_s11  ;;  %s1287_s17 = sld [smem:[#allocation2 + $0x281]] }
  0x27   : > { %v387_v35 = vadd.f32 %v385_v27, %v382_v19  ;;  %v408_v36 = vmul.f32 %v401_v28, %v401_v28  ;;  %v418_v37 = vsub.f32 %v1262_v0, %v417_v34  ;;  %v420_v38 = vstv %s1271_s12  ;;  %s1294_s20 = sld [smem:[#allocation2 + $0x282]]  ;;  %s522_s12 = sadd.s32 6, %s1290_s19 }
  0x28   : > { %v1296_v39 = vadd.f32 %v370_v23, %v367_v16  ;;  %v405_v40 = vrot.slane %v403_v32, 1  ;;  %v421_v41 = vsub.f32 %v1262_v0, %v420_v38  ;;  %v434_v42 = vstv %s1274_s13  ;;  %s1300_s24 = sld [smem:[#allocation2 + $0x300]] }
  0x29   : > { %v410_v43 = vrot.slane %v408_v36, 2  ;;  %v422_v44 = vmul.f32 %v415_v33, %v415_v33  ;;  %v423_v45 = vmul.f32 %v418_v37, %v418_v37  ;;  %v435_v46 = vsub.f32 %v1262_v0, %v434_v42  ;;  %s1303_s21 = sld [smem:[#allocation2 + $0x301]] }
  0x2a   : > { %v407_v47 = vadd.f32 %v405_v40, %v402_v29  ;;  %v428_v48 = vmul.f32 %v421_v41, %v421_v41  ;;  %v437_v49 = vstv %s1277_s14  ;;  %v440_v50 = vstv %s1280_s15  ;;  %s1308_s26 = sld [smem:[#allocation2 + $0x302]]  ;;  %s529_s14 = sadd.s32 7, %s1290_s19 }
  0x2b   : > { %v1311_v51 = vadd.f32 %v390_v31, %v387_v35  ;;  %v425_v52 = vrot.slane %v423_v45, 1  ;;  %v438_v53 = vsub.f32 %v1262_v0, %v437_v49  ;;  %v441_v54 = vsub.f32 %v1262_v0, %v440_v50  ;;  %s1316_s28 = sld [smem:[#allocation4 + %s1290_s19]] }
  0x2c   : > { %v430_v55 = vrot.slane %v428_v48, 2  ;;  %v442_v56 = vmul.f32 %v435_v46, %v435_v46  ;;  %v454_v57 = vstv %s1283_s16  ;;  %v457_v58 = vstv %s1287_s17  ;;  %s1321_s7 = sld [smem:[#allocation4 + %s497_s25]]  ;;  %s533_s16 = sadd.s32 8, %s1290_s19 }
  0x2d   : > { %v427_v59 = vadd.f32 %v425_v52, %v422_v44  ;;  %v443_v60 = vmul.f32 %v438_v53, %v438_v53  ;;  %v448_v61 = vmul.f32 %v441_v54, %v441_v54  ;;  %v455_v62 = vsub.f32 %v1262_v0, %v454_v57  ;;  %s1325_s9 = sld [smem:[#allocation4 + %s502_s27]] }
  0x2e   : > { %v1328_v63 = vadd.f32 %v410_v43, %v407_v47  ;;  %v458_v1 = vsub.f32 %v1262_v0, %v457_v58  ;;  %v460_v2 = vstv %s1294_s20  ;;  %v474_v3 = vstv %s1300_s24  ;;  %s1333_s11 = sld [smem:[#allocation4 + %s507_s29]]  ;;  %s538_s20 = sadd.s32 9, %s1290_s19 }
  0x2f   : > { %v1336_v4 = vadd.f32 %v430_v55, %v427_v59  ;;  %v445_v5 = vrot.slane %v443_v60, 1  ;;  %v450_v6 = vrot.slane %v448_v61, 2  ;;  %v461_v7 = vsub.f32 %v1262_v0, %v460_v2  ;;  %s1339_s13 = sld [smem:[#allocation4 + %s512_s8]]  ;;  %s558_s8 = sadd.s32 13, %s1290_s19  ;;  %v603_v59 = vld [vmem:[%s1658_s4] sm:$0x1] }
  0x30   : > { %v462_v8 = vmul.f32 %v455_v62, %v455_v62  ;;  %v463_v9 = vmul.f32 %v458_v1, %v458_v1  ;;  %v475_v10 = vsub.f32 %v1262_v0, %v474_v3  ;;  %v477_v11 = vstv %s1303_s21  ;;  %s1344_s15 = sld [smem:[#allocation4 + %s517_s10]]  ;;  %s543_s21 = sadd.s32 10, %s1290_s19 }
  0x31   : > { %v447_v12 = vadd.f32 %v445_v5, %v442_v56  ;;  %v468_v13 = vmul.f32 %v461_v7, %v461_v7  ;;  %v478_v14 = vsub.f32 %v1262_v0, %v477_v11  ;;  %v480_v15 = vstv %s1308_s26  ;;  %s1349_s17 = sld [smem:[#allocation4 + %s522_s12]]  ;;  %s548_s26 = sadd.s32 11, %s1290_s19 }
  0x32   : > { %v465_v16 = vrot.slane %v463_v9, 1  ;;  %v481_v17 = vsub.f32 %v1262_v0, %v480_v15  ;;  %v482_v18 = vmul.f32 %v475_v10, %v475_v10  ;;  %v495_v19 = vstv %s1316_s28  ;;  %s1354_s24 = sld [smem:[#allocation4 + %s529_s14]]  ;;  %s553_s28 = sadd.s32 12, %s1290_s19 }
  0x33   : > { %v1357_v20 = vadd.f32 %v450_v6, %v447_v12  ;;  %v470_v21 = vrot.slane %v468_v13, 2  ;;  %v483_v22 = vmul.f32 %v478_v14, %v478_v14  ;;  %vm1360_vm0 = vcmp.lt.f32.partialorder %v1296_v39, %v495_v19  ;;  %s1364_s25 = sld [smem:[#allocation4 + %s533_s16]] }
  0x34   : > { %v467_v24 = vadd.f32 %v465_v16, %v462_v8  ;;  %v488_v25 = vmul.f32 %v481_v17, %v481_v17  ;;  %v499_v26 = vstv %s1321_s7  ;;  %v504_v27 = vstv %s1325_s9  ;;  %s1369_s27 = sld [smem:[#allocation4 + %s538_s20]]  ;;  %s565_s9 = sadd.s32 14, %s1290_s19 }
  0x35   : > { %v485_v28 = vrot.slane %v483_v22, 1  ;;  %vm500_vm1 = vcmp.lt.f32.partialorder %v1311_v51, %v499_v26  ;;  %vm505_vm2 = vcmp.lt.f32.partialorder %v1328_v63, %v504_v27  ;;  %v509_v29 = vstv %s1333_s11  ;;  %s1375_s29 = sld [smem:[#allocation4 + %s543_s21]]  ;;  %s569_s11 = sadd.s32 15, %s1290_s19 }
  0x36   : > { %v1378_v30 = vadd.f32 %v470_v21, %v467_v24  ;;  %v490_v31 = vrot.slane %v488_v25, 2  ;;  %vm501_vm3 = vmor %vm1360_vm0, %vm500_vm1  ;;  %vm1383_vm4 = vcmp.lt.f32.partialorder %v1336_v4, %v509_v29  ;;  %v514_v33 = vstv %s1339_s13  ;;  %s1388_s7 = sld [smem:[#allocation4 + %s548_s26]]  ;;  %s574_s13 = sadd.s32 16, %s1290_s19 }
  0x37   : > { %v487_v34 = vadd.f32 %v485_v28, %v482_v18  ;;  %vm506_vm5 = vmor %vm501_vm3, %vm505_vm2  ;;  %vm515_vm6 = vcmp.lt.f32.partialorder %v1357_v20, %v514_v33  ;;  %v519_v35 = vstv %s1344_s15  ;;  %s1393_s10 = sld [smem:[#allocation4 + %s553_s28]]  ;;  %v524_v37 = vstv %s1349_s17  ;;  %s579_s15 = sadd.s32 17, %s1290_s19 }
  0x38   : > { %vm511_vm7 = vmor %vm506_vm5, %vm1383_vm4  ;;  %vm1399_vm8 = vcmp.lt.f32.partialorder %v1378_v30, %v519_v35  ;;  %v531_v38 = vstv %s1354_s24  ;;  %s1405_s12 = sld [smem:[#allocation4 + %s558_s8]]  ;;  %s584_s17 = sadd.s32 18, %s1290_s19  ;;  %v1166_v56 = vmov 0.0   ;;  %v606_v1 = vsub.f32 1.0, %v603_v59 }
  0x39   : > { %v1408_v40 = vadd.f32 %v490_v31, %v487_v34  ;;  %vm1410_vm9 = vmor %vm511_vm7, %vm515_vm6  ;;  %vm1415_vm10 = vcmp.lt.f32.partialorder %v1296_v39, %v531_v38  ;;  %v535_v43 = vstv %s1364_s25  ;;  %s1420_s14 = sld [smem:[#allocation4 + %s565_s9]]  ;;  %s589_s24 = sadd.s32 19, %s1290_s19 }
  0x3a   : > { %vm521_vm11 = vmor %vm1410_vm9, %vm1399_vm8  ;;  %vm1428_vm12 = vcmp.lt.f32.partialorder %v1311_v51, %v535_v43  ;;  %v540_v45 = vstv %s1369_s27  ;;  %s570_s16 = sld [smem:[#allocation4 + %s569_s11]]  ;;  %s594_s25 = sadd.s32 20, %s1290_s19 }
  0x3b   : > { %vm525_vm13 = vcmp.lt.f32.partialorder %v1408_v40, %v524_v37  ;;  %vm537_vm14 = vmor %vm1415_vm10, %vm1428_vm12  ;;  %vm541_vm15 = vcmp.lt.f32.partialorder %v1328_v63, %v540_v45  ;;  %v545_v46 = vstv %s1375_s29  ;;  %s1441_s20 = sld [smem:[#allocation4 + %s574_s13]] }
  0x3c   : > { %vm1444_vm0 = vmor %vm521_vm11, %vm525_vm13  ;;  %vm546_vm1 = vcmp.lt.f32.partialorder %v1336_v4, %v545_v46  ;;  %v550_v48 = vstv %s1388_s7  ;;  %s580_s21 = sld [smem:[#allocation4 + %s579_s15]] }
  0x3d   : > { %vm542_vm2 = vmor %vm537_vm14, %vm541_vm15  ;;  %vm551_vm3 = vcmp.lt.f32.partialorder %v1357_v20, %v550_v48  ;;  %v555_v49 = vstv %s1393_s10  ;;  %s585_s26 = sld [smem:[#allocation4 + %s584_s17]]  ;;  %v1474_v57 = vsel %vm1444_vm0, 1.0, %v1166_v56 }
  0x3e   : > { %vm547_vm4 = vmor %vm542_vm2, %vm546_vm1  ;;  %vm556_vm5 = vcmp.lt.f32.partialorder %v1378_v30, %v555_v49  ;;  %v560_v50 = vstv %s1405_s12  ;;  %s1455_s27 = sld [smem:[#allocation4 + %s589_s24]] }
  0x3f   : > { %vm552_vm6 = vmor %vm547_vm4, %vm551_vm3  ;;  %vm561_vm7 = vcmp.lt.f32.partialorder %v1408_v40, %v560_v50  ;;  %v567_v52 = vstv %s1420_s14  ;;  %s1459_s28 = sld [smem:[#allocation4 + %s594_s25]]  ;;  %vm620_vm4 = vcmask 1040384  }
  0x40   : > { %vm557_vm8 = vmor %vm552_vm6, %vm556_vm5  ;;  %vm1462_vm9 = vcmp.lt.f32.partialorder %v1296_v39, %v567_v52  ;;  %v571_v54 = vstv %s570_s16  ;;  %s1466_s19 = sld [smem:[#allocation6]] }
  0x41   : > { %vm562_vm10 = vmor %vm557_vm8, %vm561_vm7  ;;  %vm572_vm11 = vcmp.lt.f32.partialorder %v1311_v51, %v571_v54  ;;  %v576_v55 = vstv %s1441_s20  ;;  %s1470_s29 = sld [smem:[#allocation6 + $0x1]]  ;;  %vm622_vm8 = vcmask 1041408  }
  0x42   : > { %v1476_v58 = vsel %vm562_vm10, 1.0, %v1166_v56  ;;  %vm573_vm12 = vmor %vm1462_vm9, %vm572_vm11  ;;  %vm577_vm13 = vcmp.lt.f32.partialorder %v1328_v63, %v576_v55  ;;  %v581_v39 = vstv %s580_s21  ;;  %s1481_s8 = sld [smem:[#allocation6 + $0x2]]  ;;  %vm624_vm9 = vcmask 1042432  }
  0x43   : > { %vm578_vm14 = vmor %vm573_vm12, %vm577_vm13  ;;  %vm582_vm15 = vcmp.lt.f32.partialorder %v1336_v4, %v581_v39  ;;  %v586_v51 = vstv %s585_s26  ;;  %s1487_s10 = sld [smem:[#allocation6 + $0x3]]  ;;  %v609_v61 = vrot.slane %v1476_v58, 7  ;;  %v601_v63 = vmax.f32 %v1474_v57, %v1476_v58 }
  0x44   : > { %vm583_vm0 = vmor %vm578_vm14, %vm582_vm15  ;;  %vm587_vm1 = vcmp.lt.f32.partialorder %v1357_v20, %v586_v51  ;;  %v591_v60 = vstv %s1455_s27  ;;  %s1492_s11 = sld [smem:[#allocation6 + $0x4]]  ;;  %vm626_vm10 = vcmask 1043456   ;;  %vm766_vm12 = vcmask 1044480  }
  0x45   : > { %vm588_vm2 = vmor %vm583_vm0, %vm587_vm1  ;;  %vm592_vm3 = vcmp.lt.f32.partialorder %v1378_v30, %v591_v60  ;;  %v596_v62 = vstv %s1459_s28  ;;  %s1498_s12 = sld [smem:[#allocation6 + $0x5]]  ;;  %v621_v6 = vsel %vm620_vm4, %v1474_v57, %v609_v61  ;;  %vm768_vm13 = vcmask 1045504  }
  0x46   : > { %vm593_vm5 = vmor %vm588_vm2, %vm592_vm3  ;;  %vm597_vm6 = vcmp.lt.f32.partialorder %v1408_v40, %v596_v62  ;;  %v631_v2 = vstv %s1466_s19  ;;  %s1502_s13 = sld [smem:[#allocation6 + $0x6]]  ;;  %s976_s19 = sshll.u32 %s1256_s18, 3  ;;  %vm770_vm14 = vcmask 1046528  }
  0x47   : > { %vm598_vm7 = vmor %vm593_vm5, %vm597_vm6  ;;  %v632_v3 = vsub.f32 %v631_v2, %v1262_v0  ;;  %v635_v4 = vstv %s1470_s29  ;;  %s1506_s14 = sld [smem:[#allocation6 + $0x80]] }
  0x48   : > { %v1508_v5 = vsel %vm598_vm7, 1.0, %v1166_v56  ;;  %v636_v7 = vsub.f32 %v635_v4, %v1262_v0  ;;  %v642_v8 = vstv %s1481_s8  ;;  %s1514_s15 = sld [smem:[#allocation6 + $0x81]] }
  0x49   : > { %v602_v9 = vmax.f32 %v601_v63, %v1508_v5  ;;  %v612_v10 = vrot.slane %v1508_v5, 6  ;;  %v643_v11 = vsub.f32 %v642_v8, %v1262_v0  ;;  %s1519_s16 = sld [smem:[#allocation6 + $0x82]]  ;;  %v1522_v12 = vmul.f32 %v1474_v57, %v632_v3 }
  0x4a   : > { %v638_v13 = vrot.slane %v636_v7, 1  ;;  %v649_v14 = vstv %s1487_s10  ;;  %v652_v15 = vstv %s1492_s11  ;;  %s1526_s17 = sld [smem:[#allocation6 + $0x83]]  ;;  %s343_s11 = scalar_lea.vmem %s1659_s5, %s976_s19 }
  0x4b   : > { %v604_v16 = vsub.f32 1.0, %v602_v9  ;;  %v623_v17 = vsel %vm622_vm8, %v621_v6, %v612_v10  ;;  %v645_v18 = vrot.slane %v643_v11, 2  ;;  %v1530_v19 = vmul.f32 %v1474_v57, %v649_v14  ;;  %s1532_s20 = sld [smem:[#allocation6 + $0x84]] }
  0x4c   : > { %v1535_v20 = vmul.f32 %v1474_v57, %v638_v13  ;;  %v1538_v21 = vmul.f32 %v1474_v57, %v652_v15  ;;  %v655_v22 = vstv %s1498_s12  ;;  %v658_v23 = vstv %s1502_s13  ;;  %s1542_s24 = sld [smem:[#allocation6 + $0x85]]  ;;  %s1024_s12 = smul.u32 24, %s1256_s18 }
  0x4d   : > { %v605_v24 = vmul.f32 %v604_v16, %v603_v59  ;;  %v607_v25 = vmul.f32 %v606_v1, %v604_v16  ;;  %v1545_v26 = vmul.f32 %v1474_v57, %v645_v18  ;;  %v1548_v27 = vmul.f32 %v1474_v57, %v655_v22  ;;  %s1550_s21 = sld [smem:[#allocation6 + $0x86]] }
  0x4e   : > { %v1553_v28 = vmul.f32 %v1474_v57, %v658_v23  ;;  %v661_v29 = vstv %s1506_s14  ;;  %v665_v30 = vstv %s1514_s15  ;;  %s1557_s25 = sld [smem:[#allocation6 + $0x100]]  ;;  %v721_v31 = vrot.slane %v1535_v20, 7  ;;  %s351_s14 = scalar_lea.vmem %s1660_s6, %s1024_s12 }
  0x4f   : > { %v615_v32 = vperm.slane %v605_v24, 0  ;;  %v618_v33 = vperm.slane %v607_v25, 0  ;;  %v662_v34 = vsub.f32 %v661_v29, %v1262_v0  ;;  %v666_v35 = vsub.f32 %v665_v30, %v1262_v0  ;;  %s1562_s26 = sld [smem:[#allocation6 + $0x101]] }
  0x50   : > { %v672_v36 = vstv %s1519_s16  ;;  %v679_v37 = vstv %s1526_s17  ;;  %s1566_s27 = sld [smem:[#allocation6 + $0x102]]  ;;  %v724_v38 = vrot.slane %v1545_v26, 6  ;;  %v727_v40 = vrot.slane %v1530_v19, 5 }
  0x51   : > { %v625_v41 = vsel %vm624_vm9, %v623_v17, %v615_v32  ;;  %v1572_v42 = vmul.f32 %v1476_v58, %v662_v34  ;;  %v668_v43 = vrot.slane %v666_v35, 1  ;;  %v673_v44 = vsub.f32 %v672_v36, %v1262_v0  ;;  %s1575_s28 = sld [smem:[#allocation6 + $0x103]] }
  0x52   : > { %v627_v45 = vsel %vm626_vm10, %v625_v41, %v618_v33  ;;  %v680_v46 = vmul.f32 %v1476_v58, %v679_v37  ;;  %v682_v47 = vstv %s1532_s20  ;;  %v685_v48 = vstv %s1542_s24  ;;  %s1582_s29 = sld [smem:[#allocation6 + $0x104]] }
  0x53   : > { %vm1025_vm11 = vcmp.lt.s32.totalorder %v627_v45, 0  ;;  %v1026_v49 = vceil.f32 %v627_v45  ;;  %v1027_v50 = vfloor.f32 %v627_v45  ;;  %v670_v52 = vmul.f32 %v1476_v58, %v668_v43  ;;  %s1585_s8 = sld [smem:[#allocation6 + $0x105]] }
  0x54   : > { %v675_v53 = vrot.slane %v673_v44, 2  ;;  %v683_v54 = vmul.f32 %v1476_v58, %v682_v47  ;;  %v686_v55 = vmul.f32 %v1476_v58, %v685_v48  ;;  %v688_v56 = vstv %s1550_s21  ;;  %s1590_s7 = sld [smem:[#allocation6 + $0x106]] }
  0x55   : > { %v1028_v57 = vsel %vm1025_vm11, %v1026_v49, %v1027_v50  ;;  %v689_v39 = vmul.f32 %v1476_v58, %v688_v56  ;;  %v691_v51 = vstv %s1557_s25  ;;  %v695_v59 = vstv %s1562_s26 }
  0x56   : > { %v1029_v60 = vcvt.f32.s32 %v1028_v57  ;;  %v677_v61 = vmul.f32 %v1476_v58, %v675_v53  ;;  %v692_v62 = vsub.f32 %v691_v51, %v1262_v0  ;;  %v696_v63 = vsub.f32 %v695_v59, %v1262_v0 }
  0x57   : > { %v702_v1 = vstv %s1566_s27  ;;  %v709_v2 = vstv %s1575_s28  ;;  %v730_v3 = vrot.slane %v1538_v21, 4  ;;  %v733_v4 = vrot.slane %v1548_v27, 3 }
  0x58   : > { %629 = vst [vmem:[%s343_s11] sm:$0x1f] %v1029_v60  ;;  %v693_v6 = vmul.f32 %v1508_v5, %v692_v62  ;;  %v698_v7 = vrot.slane %v696_v63, 1  ;;  %v703_v8 = vsub.f32 %v702_v1, %v1262_v0  ;;  %v710_v58 = vmul.f32 %v1508_v5, %v709_v2 }
  0x59   : > { %v712_v9 = vstv %s1582_s29  ;;  %v715_v10 = vstv %s1585_s8  ;;  %v736_v11 = vrot.slane %v1553_v28, 2  ;;  %v739_v13 = vrot.slane %v1572_v42, 1 }
  0x5a   : > { %v700_v14 = vmul.f32 %v1508_v5, %v698_v7  ;;  %v705_v15 = vrot.slane %v703_v8, 2  ;;  %v713_v16 = vmul.f32 %v1508_v5, %v712_v9  ;;  %v716_v17 = vmul.f32 %v1508_v5, %v715_v10 }
  0x5b   : > { %v718_v18 = vstv %s1590_s7  ;;  %v742_v21 = vrot.slane %v677_v61, 7  ;;  %v745_v22 = vrot.slane %v680_v46, 6  ;;  %v748_v0 = vrot.slane %v683_v54, 5 }
  0x5c   : > { %v707_v23 = vmul.f32 %v1508_v5, %v705_v15  ;;  %v719_v24 = vmul.f32 %v1508_v5, %v718_v18  ;;  %v751_v25 = vrot.slane %v686_v55, 4  ;;  %v754_v27 = vrot.slane %v689_v39, 3 }
  0x5d   : > { %v757_v28 = vrot.slane %v693_v6, 2  ;;  %v760_v29 = vrot.slane %v700_v14, 1  ;;  %v762_v30 = vsel %vm620_vm4, %v1522_v12, %v721_v31  ;;  %v772_v32 = vsel %vm620_vm4, %v670_v52, %v742_v21 }
  0x5e   : > { %v763_v33 = vsel %vm622_vm8, %v762_v30, %v724_v38  ;;  %v773_v34 = vsel %vm622_vm8, %v772_v32, %v745_v22  ;;  %v780_v35 = vrot.slane %v710_v58, 7  ;;  %v783_v5 = vrot.slane %v713_v16, 6 }
  0x5f   : > { %v764_v36 = vsel %vm624_vm9, %v763_v33, %v727_v40  ;;  %v774_v37 = vsel %vm624_vm9, %v773_v34, %v748_v0  ;;  %v786_v20 = vrot.slane %v716_v17, 5  ;;  %v789_v41 = vrot.slane %v719_v24, 4 }
  0x60   : > { %v765_v12 = vsel %vm626_vm10, %v764_v36, %v730_v3  ;;  %v775_v31 = vsel %vm626_vm10, %v774_v37, %v751_v25  ;;  %v791_v26 = vsel %vm620_vm4, %v707_v23, %v780_v35 }
  0x61   : > { %v767_v38 = vsel %vm766_vm12, %v765_v12, %v733_v4  ;;  %v776_v19 = vsel %vm766_vm12, %v775_v31, %v754_v27  ;;  %v792_v40 = vsel %vm622_vm8, %v791_v26, %v783_v5 }
  0x62   : > { %v769_v42 = vsel %vm768_vm13, %v767_v38, %v736_v11  ;;  %v777_v43 = vsel %vm768_vm13, %v776_v19, %v757_v28  ;;  %v793_v44 = vsel %vm624_vm9, %v792_v40, %v786_v20 }
  0x63   : > { %v771_v45 = vsel %vm770_vm14, %v769_v42, %v739_v13  ;;  %v778_v46 = vsel %vm770_vm14, %v777_v43, %v760_v29  ;;  %v794_v47 = vsel %vm626_vm10, %v793_v44, %v789_v41 }
  0x64   : > { %795 = vst [vmem:[%s351_s14] sm:$0xff] %v771_v45 }
  0x65   : > { %796 = vst [vmem:[%s351_s14 + $0x8] sm:$0xff] %v778_v46 }
  0x66   : > { %797 = vst [vmem:[%s351_s14 + $0x10] sm:$0x1f] %v794_v47 }
  0x67 PF: > { %s19_s23 = sadd.s32 1, %s1161_s23   ;;  %s1679_s21 = smov %s1157_s22 }
  0x68   : > { %p16_p8 = scmp.ge.s32.totalorder %s19_s23, 4   ;;  %s1680_s22 = smov %s1682_s30 }
  0x6a   :  { %18 = sbr.rel (!%p16_p8) target bundleno = 3 (0x3), region = 98 }
  0x6f   :  { %845 = vsyncpa [#allocation3], 1 }
  0x70   :  { %847 = vsyncpa [#allocation3 + $0x1], 1 }
  0x71   :  { %848 = vsyncpa [#allocation5], 1 }

</bundles_post_ra>
